<compile_context>
chip_gen: v6e
topology: v6e:2x2x1
jax: 0.10.0
libtpu: 0.0.40
codegen_flags: <defaults>
</compile_context>

<pallas_src>
import functools
import math

import jax
import jax.numpy as jnp
from jax.experimental import pallas as pl
from jax.experimental.pallas import tpu as pltpu

LEAKYRELU_SLOPE = math.sqrt(5.0)
BN_EPS = 1e-5
LANE = 128
SUB_BF16 = 16   # bf16 sublane packing: keep slab segments 16-row aligned


def _round_up(n, m):
    return ((n + m - 1) // m) * m


# ---------------------------------------------------------------------------
# In-kernel helpers (traced inside the Pallas body)
# ---------------------------------------------------------------------------
def _mm(a, b):
    # bf16 operands, f32 accumulation on the MXU (default precision class).
    return jnp.dot(a, b, preferred_element_type=jnp.float32)


def _leaky_relu(x):
    return jnp.where(x >= 0, x, LEAKYRELU_SLOPE * x)


def _bn_rows(x, eps=BN_EPS):
    # Training-mode BatchNorm1d over axis 0 (Hyper_net: rows == input_size).
    # One-pass stats: mean and E[x^2] are independent reductions.
    mean = jnp.mean(x, axis=0, keepdims=True)
    msq = jnp.mean(x * x, axis=0, keepdims=True)
    return (x - mean) * jax.lax.rsqrt(msq - mean * mean + eps)


def _bn_chunks(x2d, n_chunks, batch, eps=BN_EPS):
    # Per-chunk BatchNorm: view [n_chunks*batch, F] as [n_chunks, batch, F]
    # and reduce over the batch axis of each chunk (axis=1).  batch=8 keeps the
    # reshape sublane-aligned (no data movement).
    f = x2d.shape[-1]
    x3 = x2d.reshape(n_chunks, batch, f)
    mean = jnp.mean(x3, axis=1, keepdims=True)
    msq = jnp.mean(x3 * x3, axis=1, keepdims=True)
    y = (x3 - mean) * jax.lax.rsqrt(msq - mean * mean + eps)
    return y.reshape(n_chunks * batch, f)


# ---------------------------------------------------------------------------
# Pallas kernel: the entire DNModel forward in one grid step.
#   slab_ref : [R, W] bf16  -- emb + all transposed/padded weights, packed.
#   bias_ref : [8, W] f32   -- row0 fat_bias, row1 b2_main, row2 b3_main.
#   x_ref    : [n_chunks*batch, input_size] f32
#   out_ref  : [n_chunks*batch, W] f32 (lane-dense; sliced in the wrapper)
# ---------------------------------------------------------------------------
def dn_model_kernel(slab_ref, bias_ref, x_ref, out_ref, *,
                    n_chunks, batch, input_size, W, offs):
    bf16 = jnp.bfloat16

    def seg(name, rows):
        o = offs[name]                      # static python ints -> zero-cost views
        return slab_ref[o:o + rows, :]

    emb  = seg("emb", input_size)           # exactly input_size rows (BN stats!)
    w1t  = seg("w1t", W)
    w2t  = seg("w2t", W)
    w3t  = seg("w3t", W)
    w2mt = seg("w2mt", W)
    w3mt = seg("w3mt", W)

    fat_bias = bias_ref[0:1, :]
    b2m      = bias_ref[1:2, :]
    b3m      = bias_ref[2:3, :]

    # ---------------- Hyper_net (runs exactly once) ----------------
    ae1 = _leaky_relu(_bn_rows(_mm(emb, w1t)))
    ae2 = _leaky_relu(_bn_rows(_mm(ae1.astype(bf16), w2t)))
    ze3 = _mm(ae2.astype(bf16), w3t)         # [input_size, W] f32
    # fatLayer_weights = ze3.T ; F.linear(x, fatW) == x @ ze3

    # ---------------- Target_net (all chunks in one shot) ----------------
    bn = lambda t: _bn_chunks(t, n_chunks, batch)
    x = bn(x_ref[...])                                        # bn0 (identity affine)
    z1 = _mm(x.astype(bf16), ze3.astype(bf16)) + fat_bias     # fat layer
    a1 = _leaky_relu(bn(z1))
    z2 = _mm(a1.astype(bf16), w2mt) + b2m
    a2 = _leaky_relu(bn(z2))
    out_ref[...] = _mm(a2.astype(bf16), w3mt) + b3m
    # Dropout p=0 -> identity; incl_softmax=False -> no softmax.


# ---------------------------------------------------------------------------
# Wrapper: pack/pad operands, launch a single-step pallas_call, unpad output.
# ---------------------------------------------------------------------------
def dn_model_forward(emb, x_batch, params):
    squeeze = (x_batch.ndim == 2)
    if squeeze:
        x_batch = x_batch[None]                       # [1, batch, input_size]
    n_chunks, batch, input_size = x_batch.shape

    n_hidden_u  = params["w1_aux"].shape[0]
    n_feats_emb = params["w1_aux"].shape[1]
    n_hidden1_u = params["w2_main"].shape[1]
    n_hidden2_u = params["w2_main"].shape[0]
    n_targets   = params["w3_main"].shape[0]

    # One common lane-dense width: every feature dim zero-padded to a multiple
    # of 128 so all weight tiles / activations are full vregs and the final
    # store is an unmasked lane-dense vst.  (input_size / batch axes are NOT
    # padded: they are BatchNorm reduction axes and padding would bias stats.)
    W = _round_up(max(n_feats_emb, n_hidden_u, n_hidden1_u, n_hidden2_u,
                      n_targets, LANE), LANE)

    def pad_cast(a, rows, cols):
        buf = jnp.zeros((rows, cols), jnp.bfloat16)
        return buf.at[:a.shape[0], :a.shape[1]].set(a.astype(jnp.bfloat16))

    emb_rows = _round_up(input_size, SUB_BF16)
    segs = [
        ("emb",  pad_cast(emb,                 emb_rows, W)),
        ("w1t",  pad_cast(params["w1_aux"].T,  W, W)),
        ("w2t",  pad_cast(params["w2_aux"].T,  W, W)),
        ("w3t",  pad_cast(params["w3_aux"].T,  W, W)),
        ("w2mt", pad_cast(params["w2_main"].T, W, W)),
        ("w3mt", pad_cast(params["w3_main"].T, W, W)),
    ]
    offs, row = {}, 0
    for name, arr in segs:
        offs[name] = row
        row += arr.shape[0]
    slab = jnp.concatenate([a for _, a in segs], axis=0)       # [R, W] bf16

    # Biases stay f32 (added to the f32 MXU accumulators); one 8xW vreg slab.
    bias_slab = jnp.zeros((8, W), jnp.float32)
    bias_slab = bias_slab.at[0, :n_hidden1_u].set(params["fat_bias"].reshape(-1))
    bias_slab = bias_slab.at[1, :n_hidden2_u].set(params["b2_main"].reshape(-1))
    bias_slab = bias_slab.at[2, :n_targets].set(params["b3_main"].reshape(-1))

    x2d = x_batch.reshape(n_chunks * batch, input_size).astype(jnp.float32)
    rows_out = n_chunks * batch

    kernel = functools.partial(
        dn_model_kernel,
        n_chunks=n_chunks, batch=batch, input_size=input_size, W=W, offs=offs)

    def full(shape):
        return pl.BlockSpec(shape, lambda i, _s=shape: (0,) * len(_s))

    out2d = pl.pallas_call(
        kernel,
        out_shape=jax.ShapeDtypeStruct((rows_out, W), jnp.float32),
        grid=(1,),                         # single step: no per-step overhead
        in_specs=[full(slab.shape), full(bias_slab.shape), full(x2d.shape)],
        out_specs=full((rows_out, W)),
        compiler_params=pltpu.CompilerParams(
            dimension_semantics=("arbitrary",)),
    )(slab, bias_slab, x2d)

    out = out2d[:, :n_targets].reshape(n_chunks, batch, n_targets)
    return out[0] if squeeze else out


# ---------------------------------------------------------------------------
# Pure-JAX reference (same precision class as the kernel: bf16 MXU, f32 acc)
# ---------------------------------------------------------------------------
def dn_model_reference(emb, x_batch, p):
    bf16 = jnp.bfloat16

    def mm(a, b):
        return jnp.dot(a.astype(bf16), b.astype(bf16),
                       preferred_element_type=jnp.float32)

    def bn(x):
        mean = jnp.mean(x, axis=0, keepdims=True)
        msq = jnp.mean(x * x, axis=0, keepdims=True)
        return (x - mean) * jax.lax.rsqrt(msq - mean * mean + BN_EPS)

    def lrelu(x):
        return jnp.where(x >= 0, x, LEAKYRELU_SLOPE * x)

    ae1 = lrelu(bn(mm(emb, p["w1_aux"].T)))
    ae2 = lrelu(bn(mm(ae1, p["w2_aux"].T)))
    ze3 = mm(ae2, p["w3_aux"].T)

    def one(xb):
        x = bn(xb)
        z1 = mm(x, ze3) + p["fat_bias"]
        a1 = lrelu(bn(z1))
        z2 = mm(a1, p["w2_main"].T) + p["b2_main"]
        a2 = lrelu(bn(z2))
        return mm(a2, p["w3_main"].T) + p["b3_main"]

    if x_batch.ndim == 2:
        return one(x_batch)
    return jnp.stack([one(x_batch[i]) for i in range(x_batch.shape[0])])


# ---------------------------------------------------------------------------
# Deterministic parameter construction (shapes per DNModel.__init__)
# ---------------------------------------------------------------------------
def make_params(key, n_feats_emb, n_hidden_u, n_hidden1_u, n_hidden2_u, n_targets):
    assert n_hidden_u == n_hidden1_u, "fat layer requires n_hidden_u == n_hidden1_u"
    ks = jax.random.split(key, 5)

    def kaiming_uniform(k, out_f, in_f):
        # mimic nn.Linear default init (kaiming_uniform, a=sqrt(5))
        bound = 1.0 / math.sqrt(in_f)
        return jax.random.uniform(k, (out_f, in_f), jnp.float32, -bound, bound)

    return {
        # Hyper_net (all bias-free Linears)
        "w1_aux": kaiming_uniform(ks[0], n_hidden_u, n_feats_emb),
        "w2_aux": kaiming_uniform(ks[1], n_hidden_u, n_hidden_u),
        "w3_aux": kaiming_uniform(ks[2], n_hidden_u, n_hidden_u),
        # Target_net (biases zero-initialized by the module, but trainable)
        "fat_bias": jnp.zeros((1, n_hidden1_u), jnp.float32),
        "w2_main": kaiming_uniform(ks[3], n_hidden2_u, n_hidden1_u),
        "b2_main": jnp.zeros((1, n_hidden2_u), jnp.float32),
        "w3_main": kaiming_uniform(ks[4], n_targets, n_hidden2_u),
        "b3_main": jnp.zeros((1, n_targets), jnp.float32),
    }


if __name__ == "__main__":
    # Small, consistent shapes.  batch is a multiple of 8 sublanes; hidden
    # widths get zero-padded to 128 lanes inside the wrapper.
    input_size = 16      # features of x_batch == rows of emb
    n_feats_emb = 32
    n_hidden_u = 32      # == n_hidden1_u (required by the fat layer)
    n_hidden1_u = 32
    n_hidden2_u = 32
    n_targets = 4
    batch = 8
    n_chunks = 4         # independent forward calls, all handled in one step

    key = jax.random.PRNGKey(0)
    k_emb, k_x, k_p = jax.random.split(key, 3)

    emb = jax.random.normal(k_emb, (input_size, n_feats_emb), jnp.float32)
    x_chunks = jax.random.normal(k_x, (n_chunks, batch, input_size), jnp.float32)
    params = make_params(k_p, n_feats_emb, n_hidden_u, n_hidden1_u,
                         n_hidden2_u, n_targets)

    out = dn_model_forward(emb, x_chunks, params)
    out = jax.block_until_ready(out)
    assert out.shape == (n_chunks, batch, n_targets)

    ref = dn_model_reference(emb, x_chunks, params)
    assert jnp.allclose(out, ref, rtol=2e-3, atol=2e-3), (
        f"mismatch: max abs err {jnp.max(jnp.abs(out - ref))}")

    # Also exercise the single-batch (2-D input) path.
    out1 = jax.block_until_ready(dn_model_forward(emb, x_chunks[0], params))
    assert out1.shape == (batch, n_targets)
    assert jnp.allclose(out1, ref[0], rtol=2e-3, atol=2e-3)

    print("KERNEL_OK")
</pallas_src>

<mosaic_0001>
module attributes {stable_mosaic.version = 11 : i64} {
  func.func @dn_model_kernel(%arg0: i32, %arg1: memref<656x128xbf16, #tpu.memory_space<vmem>>, %arg2: memref<8x128xf32, #tpu.memory_space<vmem>>, %arg3: memref<32x16xf32, #tpu.memory_space<vmem>>, %arg4: memref<32x128xf32, #tpu.memory_space<vmem>>) attributes {dimension_semantics = [#tpu.dimension_semantics<arbitrary>], iteration_bounds = array<i64: 1>, scalar_prefetch = 0 : i64, scratch_operands = 0 : i64, tpu.core_type = #tpu.core_type<tc>, window_params = [{pipeline_mode = #tpu.pipeline_mode<synchronous>, transform_indices = @transform_0, window_bounds = array<i64: 656, 128>}, {pipeline_mode = #tpu.pipeline_mode<synchronous>, transform_indices = @transform_1, window_bounds = array<i64: 8, 128>}, {pipeline_mode = #tpu.pipeline_mode<synchronous>, transform_indices = @transform_2, window_bounds = array<i64: 32, 16>}, {pipeline_mode = #tpu.pipeline_mode<synchronous>, transform_indices = @transform_3, window_bounds = array<i64: 32, 128>}]} {
    %c0 = arith.constant 0 : index
    %c0_0 = arith.constant 0 : index
    %0 = vector.load %arg1[%c0, %c0_0] : memref<656x128xbf16, #tpu.memory_space<vmem>>, vector<16x128xbf16>
    %c16 = arith.constant 16 : index
    %c0_1 = arith.constant 0 : index
    %1 = vector.load %arg1[%c16, %c0_1] : memref<656x128xbf16, #tpu.memory_space<vmem>>, vector<128x128xbf16>
    %c144 = arith.constant 144 : index
    %c0_2 = arith.constant 0 : index
    %2 = vector.load %arg1[%c144, %c0_2] : memref<656x128xbf16, #tpu.memory_space<vmem>>, vector<128x128xbf16>
    %c272 = arith.constant 272 : index
    %c0_3 = arith.constant 0 : index
    %3 = vector.load %arg1[%c272, %c0_3] : memref<656x128xbf16, #tpu.memory_space<vmem>>, vector<128x128xbf16>
    %c400 = arith.constant 400 : index
    %c0_4 = arith.constant 0 : index
    %4 = vector.load %arg1[%c400, %c0_4] : memref<656x128xbf16, #tpu.memory_space<vmem>>, vector<128x128xbf16>
    %c528 = arith.constant 528 : index
    %c0_5 = arith.constant 0 : index
    %5 = vector.load %arg1[%c528, %c0_5] : memref<656x128xbf16, #tpu.memory_space<vmem>>, vector<128x128xbf16>
    %c0_6 = arith.constant 0 : index
    %c0_7 = arith.constant 0 : index
    %6 = vector.load %arg2[%c0_6, %c0_7] : memref<8x128xf32, #tpu.memory_space<vmem>>, vector<1x128xf32>
    %c1 = arith.constant 1 : index
    %c0_8 = arith.constant 0 : index
    %7 = vector.load %arg2[%c1, %c0_8] : memref<8x128xf32, #tpu.memory_space<vmem>>, vector<1x128xf32>
    %c2 = arith.constant 2 : index
    %c0_9 = arith.constant 0 : index
    %8 = vector.load %arg2[%c2, %c0_9] : memref<8x128xf32, #tpu.memory_space<vmem>>, vector<1x128xf32>
    %cst = arith.constant dense<0.000000e+00> : vector<16x128xf32>
    %9 = tpu.matmul %0, %1, %cst {dimension_numbers = #tpu.dot_dimension_numbers<[1], [0], [0], [1], [0, 0, 1, 1], [], []>} : vector<16x128xbf16>, vector<128x128xbf16>, vector<16x128xf32> -> vector<16x128xf32>
    %cst_10 = arith.constant dense<0.000000e+00> : vector<128xf32>
    %10 = vector.multi_reduction <add>, %9, %cst_10 [0] : vector<16x128xf32> to vector<128xf32>
    %11 = vector.shape_cast %10 : vector<128xf32> to vector<1x128xf32>
    %cst_11 = arith.constant 1.600000e+01 : f32
    %12 = vector.broadcast %cst_11 : f32 to vector<1x128xf32>
    %13 = arith.divf %11, %12 : vector<1x128xf32>
    %14 = arith.mulf %9, %9 : vector<16x128xf32>
    %cst_12 = arith.constant dense<0.000000e+00> : vector<128xf32>
    %15 = vector.multi_reduction <add>, %14, %cst_12 [0] : vector<16x128xf32> to vector<128xf32>
    %16 = vector.shape_cast %15 : vector<128xf32> to vector<1x128xf32>
    %cst_13 = arith.constant 1.600000e+01 : f32
    %17 = vector.broadcast %cst_13 : f32 to vector<1x128xf32>
    %18 = arith.divf %16, %17 : vector<1x128xf32>
    %19 = vector.broadcast %13 : vector<1x128xf32> to vector<16x128xf32>
    %20 = arith.subf %9, %19 : vector<16x128xf32>
    %21 = arith.mulf %13, %13 : vector<1x128xf32>
    %22 = arith.subf %18, %21 : vector<1x128xf32>
    %cst_14 = arith.constant 9.99999974E-6 : f32
    %23 = vector.broadcast %cst_14 : f32 to vector<1x128xf32>
    %24 = arith.addf %22, %23 : vector<1x128xf32>
    %25 = math.rsqrt %24 : vector<1x128xf32>
    %26 = vector.broadcast %25 : vector<1x128xf32> to vector<16x128xf32>
    %27 = arith.mulf %20, %26 : vector<16x128xf32>
    %cst_15 = arith.constant 0.000000e+00 : f32
    %28 = vector.broadcast %cst_15 : f32 to vector<16x128xf32>
    %29 = arith.cmpf oge, %27, %28 : vector<16x128xf32>
    %cst_16 = arith.constant 2.23606801 : f32
    %30 = vector.broadcast %cst_16 : f32 to vector<16x128xf32>
    %31 = arith.mulf %30, %27 : vector<16x128xf32>
    %32 = arith.select %29, %27, %31 : vector<16x128xi1>, vector<16x128xf32>
    %33 = arith.truncf %32 : vector<16x128xf32> to vector<16x128xbf16>
    %cst_17 = arith.constant dense<0.000000e+00> : vector<16x128xf32>
    %34 = tpu.matmul %33, %2, %cst_17 {dimension_numbers = #tpu.dot_dimension_numbers<[1], [0], [0], [1], [0, 0, 1, 1], [], []>} : vector<16x128xbf16>, vector<128x128xbf16>, vector<16x128xf32> -> vector<16x128xf32>
    %cst_18 = arith.constant dense<0.000000e+00> : vector<128xf32>
    %35 = vector.multi_reduction <add>, %34, %cst_18 [0] : vector<16x128xf32> to vector<128xf32>
    %36 = vector.shape_cast %35 : vector<128xf32> to vector<1x128xf32>
    %cst_19 = arith.constant 1.600000e+01 : f32
    %37 = vector.broadcast %cst_19 : f32 to vector<1x128xf32>
    %38 = arith.divf %36, %37 : vector<1x128xf32>
    %39 = arith.mulf %34, %34 : vector<16x128xf32>
    %cst_20 = arith.constant dense<0.000000e+00> : vector<128xf32>
    %40 = vector.multi_reduction <add>, %39, %cst_20 [0] : vector<16x128xf32> to vector<128xf32>
    %41 = vector.shape_cast %40 : vector<128xf32> to vector<1x128xf32>
    %cst_21 = arith.constant 1.600000e+01 : f32
    %42 = vector.broadcast %cst_21 : f32 to vector<1x128xf32>
    %43 = arith.divf %41, %42 : vector<1x128xf32>
    %44 = vector.broadcast %38 : vector<1x128xf32> to vector<16x128xf32>
    %45 = arith.subf %34, %44 : vector<16x128xf32>
    %46 = arith.mulf %38, %38 : vector<1x128xf32>
    %47 = arith.subf %43, %46 : vector<1x128xf32>
    %cst_22 = arith.constant 9.99999974E-6 : f32
    %48 = vector.broadcast %cst_22 : f32 to vector<1x128xf32>
    %49 = arith.addf %47, %48 : vector<1x128xf32>
    %50 = math.rsqrt %49 : vector<1x128xf32>
    %51 = vector.broadcast %50 : vector<1x128xf32> to vector<16x128xf32>
    %52 = arith.mulf %45, %51 : vector<16x128xf32>
    %cst_23 = arith.constant 0.000000e+00 : f32
    %53 = vector.broadcast %cst_23 : f32 to vector<16x128xf32>
    %54 = arith.cmpf oge, %52, %53 : vector<16x128xf32>
    %cst_24 = arith.constant 2.23606801 : f32
    %55 = vector.broadcast %cst_24 : f32 to vector<16x128xf32>
    %56 = arith.mulf %55, %52 : vector<16x128xf32>
    %57 = arith.select %54, %52, %56 : vector<16x128xi1>, vector<16x128xf32>
    %58 = arith.truncf %57 : vector<16x128xf32> to vector<16x128xbf16>
    %cst_25 = arith.constant dense<0.000000e+00> : vector<16x128xf32>
    %59 = tpu.matmul %58, %3, %cst_25 {dimension_numbers = #tpu.dot_dimension_numbers<[1], [0], [0], [1], [0, 0, 1, 1], [], []>} : vector<16x128xbf16>, vector<128x128xbf16>, vector<16x128xf32> -> vector<16x128xf32>
    %c0_26 = arith.constant 0 : index
    %c0_27 = arith.constant 0 : index
    %60 = vector.load %arg3[%c0_26, %c0_27] : memref<32x16xf32, #tpu.memory_space<vmem>>, vector<32x16xf32>
    %61 = vector.shape_cast %60 : vector<32x16xf32> to vector<4x8x16xf32>
    %cst_28 = arith.constant dense<0.000000e+00> : vector<4x16xf32>
    %62 = vector.multi_reduction <add>, %61, %cst_28 [1] : vector<4x8x16xf32> to vector<4x16xf32>
    %63 = vector.shape_cast %62 : vector<4x16xf32> to vector<4x1x16xf32>
    %cst_29 = arith.constant 8.000000e+00 : f32
    %64 = vector.broadcast %cst_29 : f32 to vector<4x1x16xf32>
    %65 = arith.divf %63, %64 : vector<4x1x16xf32>
    %66 = arith.mulf %61, %61 : vector<4x8x16xf32>
    %cst_30 = arith.constant dense<0.000000e+00> : vector<4x16xf32>
    %67 = vector.multi_reduction <add>, %66, %cst_30 [1] : vector<4x8x16xf32> to vector<4x16xf32>
    %68 = vector.shape_cast %67 : vector<4x16xf32> to vector<4x1x16xf32>
    %cst_31 = arith.constant 8.000000e+00 : f32
    %69 = vector.broadcast %cst_31 : f32 to vector<4x1x16xf32>
    %70 = arith.divf %68, %69 : vector<4x1x16xf32>
    %71 = vector.broadcast %65 : vector<4x1x16xf32> to vector<4x8x16xf32>
    %72 = arith.subf %61, %71 : vector<4x8x16xf32>
    %73 = arith.mulf %65, %65 : vector<4x1x16xf32>
    %74 = arith.subf %70, %73 : vector<4x1x16xf32>
    %cst_32 = arith.constant 9.99999974E-6 : f32
    %75 = vector.broadcast %cst_32 : f32 to vector<4x1x16xf32>
    %76 = arith.addf %74, %75 : vector<4x1x16xf32>
    %77 = math.rsqrt %76 : vector<4x1x16xf32>
    %78 = vector.broadcast %77 : vector<4x1x16xf32> to vector<4x8x16xf32>
    %79 = arith.mulf %72, %78 : vector<4x8x16xf32>
    %80 = vector.shape_cast %79 : vector<4x8x16xf32> to vector<32x16xf32>
    %81 = arith.truncf %80 : vector<32x16xf32> to vector<32x16xbf16>
    %82 = arith.truncf %59 : vector<16x128xf32> to vector<16x128xbf16>
    %cst_33 = arith.constant dense<0.000000e+00> : vector<32x128xf32>
    %83 = tpu.matmul %81, %82, %cst_33 {dimension_numbers = #tpu.dot_dimension_numbers<[1], [0], [0], [1], [0, 0, 1, 1], [], []>} : vector<32x16xbf16>, vector<16x128xbf16>, vector<32x128xf32> -> vector<32x128xf32>
    %84 = vector.broadcast %6 : vector<1x128xf32> to vector<32x128xf32>
    %85 = arith.addf %83, %84 : vector<32x128xf32>
    %86 = vector.shape_cast %85 : vector<32x128xf32> to vector<4x8x128xf32>
    %cst_34 = arith.constant dense<0.000000e+00> : vector<4x128xf32>
    %87 = vector.multi_reduction <add>, %86, %cst_34 [1] : vector<4x8x128xf32> to vector<4x128xf32>
    %88 = vector.shape_cast %87 : vector<4x128xf32> to vector<4x1x128xf32>
    %cst_35 = arith.constant 8.000000e+00 : f32
    %89 = vector.broadcast %cst_35 : f32 to vector<4x1x128xf32>
    %90 = arith.divf %88, %89 : vector<4x1x128xf32>
    %91 = arith.mulf %86, %86 : vector<4x8x128xf32>
    %cst_36 = arith.constant dense<0.000000e+00> : vector<4x128xf32>
    %92 = vector.multi_reduction <add>, %91, %cst_36 [1] : vector<4x8x128xf32> to vector<4x128xf32>
    %93 = vector.shape_cast %92 : vector<4x128xf32> to vector<4x1x128xf32>
    %cst_37 = arith.constant 8.000000e+00 : f32
    %94 = vector.broadcast %cst_37 : f32 to vector<4x1x128xf32>
    %95 = arith.divf %93, %94 : vector<4x1x128xf32>
    %96 = vector.broadcast %90 : vector<4x1x128xf32> to vector<4x8x128xf32>
    %97 = arith.subf %86, %96 : vector<4x8x128xf32>
    %98 = arith.mulf %90, %90 : vector<4x1x128xf32>
    %99 = arith.subf %95, %98 : vector<4x1x128xf32>
    %cst_38 = arith.constant 9.99999974E-6 : f32
    %100 = vector.broadcast %cst_38 : f32 to vector<4x1x128xf32>
    %101 = arith.addf %99, %100 : vector<4x1x128xf32>
    %102 = math.rsqrt %101 : vector<4x1x128xf32>
    %103 = vector.broadcast %102 : vector<4x1x128xf32> to vector<4x8x128xf32>
    %104 = arith.mulf %97, %103 : vector<4x8x128xf32>
    %105 = vector.shape_cast %104 : vector<4x8x128xf32> to vector<32x128xf32>
    %cst_39 = arith.constant 0.000000e+00 : f32
    %106 = vector.broadcast %cst_39 : f32 to vector<32x128xf32>
    %107 = arith.cmpf oge, %105, %106 : vector<32x128xf32>
    %cst_40 = arith.constant 2.23606801 : f32
    %108 = vector.broadcast %cst_40 : f32 to vector<32x128xf32>
    %109 = arith.mulf %108, %105 : vector<32x128xf32>
    %110 = arith.select %107, %105, %109 : vector<32x128xi1>, vector<32x128xf32>
    %111 = arith.truncf %110 : vector<32x128xf32> to vector<32x128xbf16>
    %cst_41 = arith.constant dense<0.000000e+00> : vector<32x128xf32>
    %112 = tpu.matmul %111, %4, %cst_41 {dimension_numbers = #tpu.dot_dimension_numbers<[1], [0], [0], [1], [0, 0, 1, 1], [], []>} : vector<32x128xbf16>, vector<128x128xbf16>, vector<32x128xf32> -> vector<32x128xf32>
    %113 = vector.broadcast %7 : vector<1x128xf32> to vector<32x128xf32>
    %114 = arith.addf %112, %113 : vector<32x128xf32>
    %115 = vector.shape_cast %114 : vector<32x128xf32> to vector<4x8x128xf32>
    %cst_42 = arith.constant dense<0.000000e+00> : vector<4x128xf32>
    %116 = vector.multi_reduction <add>, %115, %cst_42 [1] : vector<4x8x128xf32> to vector<4x128xf32>
    %117 = vector.shape_cast %116 : vector<4x128xf32> to vector<4x1x128xf32>
    %cst_43 = arith.constant 8.000000e+00 : f32
    %118 = vector.broadcast %cst_43 : f32 to vector<4x1x128xf32>
    %119 = arith.divf %117, %118 : vector<4x1x128xf32>
    %120 = arith.mulf %115, %115 : vector<4x8x128xf32>
    %cst_44 = arith.constant dense<0.000000e+00> : vector<4x128xf32>
    %121 = vector.multi_reduction <add>, %120, %cst_44 [1] : vector<4x8x128xf32> to vector<4x128xf32>
    %122 = vector.shape_cast %121 : vector<4x128xf32> to vector<4x1x128xf32>
    %cst_45 = arith.constant 8.000000e+00 : f32
    %123 = vector.broadcast %cst_45 : f32 to vector<4x1x128xf32>
    %124 = arith.divf %122, %123 : vector<4x1x128xf32>
    %125 = vector.broadcast %119 : vector<4x1x128xf32> to vector<4x8x128xf32>
    %126 = arith.subf %115, %125 : vector<4x8x128xf32>
    %127 = arith.mulf %119, %119 : vector<4x1x128xf32>
    %128 = arith.subf %124, %127 : vector<4x1x128xf32>
    %cst_46 = arith.constant 9.99999974E-6 : f32
    %129 = vector.broadcast %cst_46 : f32 to vector<4x1x128xf32>
    %130 = arith.addf %128, %129 : vector<4x1x128xf32>
    %131 = math.rsqrt %130 : vector<4x1x128xf32>
    %132 = vector.broadcast %131 : vector<4x1x128xf32> to vector<4x8x128xf32>
    %133 = arith.mulf %126, %132 : vector<4x8x128xf32>
    %134 = vector.shape_cast %133 : vector<4x8x128xf32> to vector<32x128xf32>
    %cst_47 = arith.constant 0.000000e+00 : f32
    %135 = vector.broadcast %cst_47 : f32 to vector<32x128xf32>
    %136 = arith.cmpf oge, %134, %135 : vector<32x128xf32>
    %cst_48 = arith.constant 2.23606801 : f32
    %137 = vector.broadcast %cst_48 : f32 to vector<32x128xf32>
    %138 = arith.mulf %137, %134 : vector<32x128xf32>
    %139 = arith.select %136, %134, %138 : vector<32x128xi1>, vector<32x128xf32>
    %140 = arith.truncf %139 : vector<32x128xf32> to vector<32x128xbf16>
    %cst_49 = arith.constant dense<0.000000e+00> : vector<32x128xf32>
    %141 = tpu.matmul %140, %5, %cst_49 {dimension_numbers = #tpu.dot_dimension_numbers<[1], [0], [0], [1], [0, 0, 1, 1], [], []>} : vector<32x128xbf16>, vector<128x128xbf16>, vector<32x128xf32> -> vector<32x128xf32>
    %142 = vector.broadcast %8 : vector<1x128xf32> to vector<32x128xf32>
    %143 = arith.addf %141, %142 : vector<32x128xf32>
    %c0_50 = arith.constant 0 : index
    %c0_51 = arith.constant 0 : index
    %144 = vector.load %arg4[%c0_50, %c0_51] : memref<32x128xf32, #tpu.memory_space<vmem>>, vector<32x128xf32>
    tpu.vector_store %arg4[%c0_50, %c0_51], %143 {strides = array<i32>} : memref<32x128xf32, #tpu.memory_space<vmem>>, vector<32x128xf32>,
    return
  }
  func.func @transform_0(%arg0: i32) -> (i32, i32) {
    %c0_i32 = arith.constant 0 : i32
    %c0_i32_0 = arith.constant 0 : i32
    %c0_i32_1 = arith.constant 0 : i32
    return %c0_i32, %c0_i32_0 : i32, i32
  }
  func.func @transform_1(%arg0: i32) -> (i32, i32) {
    %c0_i32 = arith.constant 0 : i32
    %c0_i32_0 = arith.constant 0 : i32
    %c0_i32_1 = arith.constant 0 : i32
    return %c0_i32, %c0_i32_0 : i32, i32
  }
  func.func @transform_2(%arg0: i32) -> (i32, i32) {
    %c0_i32 = arith.constant 0 : i32
    %c0_i32_0 = arith.constant 0 : i32
    %c0_i32_1 = arith.constant 0 : i32
    return %c0_i32, %c0_i32_0 : i32, i32
  }
  func.func @transform_3(%arg0: i32) -> (i32, i32) {
    %c0_i32 = arith.constant 0 : i32
    %c0_i32_0 = arith.constant 0 : i32
    %c0_i32_1 = arith.constant 0 : i32
    return %c0_i32, %c0_i32_0 : i32, i32
  }
}

</mosaic_0001>

<bundles_post_ra>
// kernel: tpu_custom_call.1
= control target key start
LH: loop header
LB: loop body
LE: loop exit
PB: predicated region body
PF: predicated region fallthrough
CT: control target
= control target key end

     0   :  { %8 = vsyncpa [#allocation3], 0  ;;  %s1508_s0 = inlined_call_operand.hbm [shape: bf16[656,128], index: 0, kind: input, shape index: {}]   ;;  %s1509_s1 = inlined_call_operand.vmem [shape: f32[8,128], index: 1, kind: input, shape index: {}]   ;;  %s1510_s2 = inlined_call_operand.vmem [shape: f32[32,16], index: 2, kind: input, shape index: {}]   ;;  %s1511_s3 = inlined_call_operand.hbm [shape: f32[32,128], index: 3, kind: output, shape index: {}]  }
   0x1   :  { %9 = vsyncpa [#allocation4], 0  ;;  %s1357_s12 = smov [#allocation2]  }
   0x2   :  { %s15_s13 = sshll.u32 %s1357_s12, 4  ;;  %s16_s13 = int_to_ptr.vmem [resolvable:$true] %s15_s13 }
   0x3   :  { %s1321_s14 = scalar_lea.vmem %s16_s13, 5248  ;;  %p1326_p1 = scmp.lt.s32.totalorder %s16_s13, %s16_s13 }
   0x4   :  { %p1322_p0 = scmp.ne.s32.totalorder %s16_s13, %s1321_s14  ;;  %p1327_p2 = scmp.lt.s32.totalorder %s1321_s14, %s1321_s14 }
   0x6   :  { %p1328_p3 = por %p1327_p2, %p1326_p1 }
   0x8   :  { %p1329_p4 = pnand %p1328_p3, %p1322_p0 }
   0xa   :  { %1332 = shalt.err (!%p1329_p4)
}
   0xb   :  { %s1358_s15 = smov 64   ;;  %s1359_s16 = smov 4  }
   0xc   :  { %21 = dma.hbm_to_vmem [thread:$0]  %s1508_s0, 5248, %s16_s13, [#allocation3], %s1358_s15, %s1358_s15, %s1359_s16  }
   0xd   :  { %1353 = dma.done.wait [#allocation3], 5248  }
   0xe   :  { %1354 = vsyncadd [#allocation3], 4294962048  ;;  %v1360_v0 = vmov 0.0   ;;  %vm1361_vm0 = vmmov 0   ;;  %v1244_v1 = vld [vmem:[#allocation2 + $0x40] sm:$0xff]   ;;  %v1245_v2 = vld [vmem:[#allocation2 + $0x38] sm:$0xff]  }
   0xf   :  { %1130 = vmatprep.subr.bf16.mxu0 %v1360_v0  ;;  %1146 = vmatprep.mubr.msk.bf16.mxu0 %vm1361_vm0, %v1360_v0  ;;  %v1246_v3 = vld [vmem:[#allocation2 + $0x30] sm:$0xff]   ;;  %v1247_v4 = vld [vmem:[#allocation2 + $0x28] sm:$0xff]   ;;  %v1248_v5 = vld [vmem:[#allocation2 + $0x20] sm:$0xff]   ;;  %vm459_vm5 = vcmask 130048   ;;  %s1362_s4 = smov [#allocation5]  }
  0x10   :  { %1150 = vmatprep.subr.bf16.mxu1 %v1360_v0  ;;  %1166 = vmatprep.mubr.msk.bf16.mxu1 %vm1361_vm0, %v1360_v0  ;;  %v1249_v6 = vld [vmem:[#allocation2 + $0x18] sm:$0xff]   ;;  %v1250_v7 = vld [vmem:[#allocation2 + $0x10] sm:$0xff]   ;;  %v1251_v8 = vld [vmem:[#allocation2 + $0x8] sm:$0xff]   ;;  %s1022_s5 = sshll.u32 %s1362_s4, 4  ;;  %s1023_s5 = int_to_ptr.vmem [resolvable:$true] %s1022_s5 }
  0x11   :  { %1131 = vmatpush3.bf16.msra.mxu0 %v1244_v1  ;;  %v1252_v9 = vld [vmem:[#allocation2] sm:$0xff]   ;;  %v1254_v11 = vld [vmem:[#allocation2 + $0x78] sm:$0xff]   ;;  %v1255_v12 = vld [vmem:[#allocation2 + $0x70] sm:$0xff]   ;;  %s1333_s6 = scalar_lea.vmem %s1023_s5, 512  ;;  %p1338_p6 = scmp.lt.s32.totalorder %s1023_s5, %s1023_s5 }
  0x12   :  { %1132 = vmatprep.subr.bf16.mxu0 %v1360_v0  ;;  %v1253_v10 = vld [vmem:[#allocation2 + $0x80] sm:$0xff]   ;;  %v1256_v13 = vld [vmem:[#allocation2 + $0x68] sm:$0xff]   ;;  %v1258_v15 = vld [vmem:[#allocation2 + $0x58] sm:$0xff]   ;;  %p1334_p5 = scmp.ne.s32.totalorder %s1023_s5, %s1333_s6  ;;  %p1339_p7 = scmp.lt.s32.totalorder %s1333_s6, %s1333_s6 }
  0x13   :  { %1151 = vmatpush3.bf16.msra.mxu1 %v1253_v10  ;;  %v1257_v14 = vld [vmem:[#allocation2 + $0x60] sm:$0xff]   ;;  %v1259_v16 = vld [vmem:[#allocation2 + $0x50] sm:$0xff]   ;;  %v1260_v17 = vld [vmem:[#allocation2 + $0x48] sm:$0xff]  }
  0x14   :  { %1152 = vmatprep.subr.bf16.mxu1 %v1360_v0  ;;  %v1261_v53 = vld [vmem:[#allocation2 + $0xc0] sm:$0xff]   ;;  %v1262_v54 = vld [vmem:[#allocation2 + $0xb8] sm:$0xff]   ;;  %v1263_v55 = vld [vmem:[#allocation2 + $0xb0] sm:$0xff]   ;;  %p1340_p8 = por %p1339_p7, %p1338_p6 }
  0x15   :  { %1133 = vmatpush3.bf16.msra.mxu0 %v1245_v2  ;;  %v1264_v56 = vld [vmem:[#allocation2 + $0xa8] sm:$0xff]   ;;  %v1265_v57 = vld [vmem:[#allocation2 + $0xa0] sm:$0xff]   ;;  %v1266_v58 = vld [vmem:[#allocation2 + $0x98] sm:$0xff]  }
  0x16   :  { %1134 = vmatprep.subr.bf16.mxu0 %v1360_v0  ;;  %v1267_v59 = vld [vmem:[#allocation2 + $0x90] sm:$0xff]   ;;  %v1268_v60 = vld [vmem:[#allocation2 + $0x88] sm:$0xff]   ;;  %p1341_p9 = pnand %p1340_p8, %p1334_p5 }
  0x17   :  { %1153 = vmatpush3.bf16.msra.mxu1 %v1254_v11 }
  0x18   :  { %1154 = vmatprep.subr.bf16.mxu1 %v1360_v0 }
  0x19   :  { %1135 = vmatpush3.bf16.msra.mxu0 %v1246_v3 }
  0x1a   :  { %1136 = vmatprep.subr.bf16.mxu0 %v1360_v0 }
  0x1b   :  { %1155 = vmatpush3.bf16.msra.mxu1 %v1255_v12 }
  0x1c   :  { %1156 = vmatprep.subr.bf16.mxu1 %v1360_v0 }
  0x1d   :  { %1137 = vmatpush3.bf16.msra.mxu0 %v1247_v4 }
  0x1e   :  { %1138 = vmatprep.subr.bf16.mxu0 %v1360_v0 }
  0x1f   :  { %1157 = vmatpush3.bf16.msra.mxu1 %v1256_v13 }
  0x20   :  { %1158 = vmatprep.subr.bf16.mxu1 %v1360_v0 }
  0x21   :  { %1139 = vmatpush3.bf16.msra.mxu0 %v1248_v5 }
  0x22   :  { %1140 = vmatprep.subr.bf16.mxu0 %v1360_v0 }
  0x23   :  { %1159 = vmatpush3.bf16.msra.mxu1 %v1257_v14 }
  0x24   :  { %1160 = vmatprep.subr.bf16.mxu1 %v1360_v0 }
  0x25   :  { %1141 = vmatpush3.bf16.msra.mxu0 %v1249_v6 }
  0x26   :  { %1142 = vmatprep.subr.bf16.mxu0 %v1360_v0 }
  0x27   :  { %1161 = vmatpush3.bf16.msra.mxu1 %v1258_v15 }
  0x28   :  { %1162 = vmatprep.subr.bf16.mxu1 %v1360_v0 }
  0x29   :  { %1143 = vmatpush3.bf16.msra.mxu0 %v1250_v7 }
  0x2a   :  { %1144 = vmatprep.subr.bf16.mxu0 %v1360_v0 }
  0x2b   :  { %1163 = vmatpush3.bf16.msra.mxu1 %v1259_v16 }
  0x2c   :  { %1164 = vmatprep.subr.bf16.mxu1 %v1360_v0 }
  0x2d   :  { %1145 = vmatpush3.bf16.msra.mxu0 %v1251_v8 }
  0x2e   :  { %1170 = vmatprep.subr.bf16.mxu0 %v1360_v0 }
  0x2f   :  { %1165 = vmatpush3.bf16.msra.mxu1 %v1260_v17 }
  0x30   :  { %1147 = vmatmul.mubr.bf16.vlgmr.msra.gmra.mxu0 %v1252_v9 }
  0x31   :  { %1186 = vmatprep.mubr.msk.bf16.mxu0 %vm1361_vm0, %v1360_v0  ;;  %1171 = vmatpush3.bf16.msra.mxu0 %v1261_v53 }
  0x32   :  { %1172 = vmatprep.subr.bf16.mxu0 %v1360_v0 }
  0x35   :  { %1173 = vmatpush3.bf16.msra.mxu0 %v1262_v54 }
  0x36   :  { %1174 = vmatprep.subr.bf16.mxu0 %v1360_v0 }
  0x39   :  { %1175 = vmatpush3.bf16.msra.mxu0 %v1263_v55 }
  0x3a   :  { %1176 = vmatprep.subr.bf16.mxu0 %v1360_v0 }
  0x3d   :  { %1177 = vmatpush3.bf16.msra.mxu0 %v1264_v56 }
  0x3e   :  { %1178 = vmatprep.subr.bf16.mxu0 %v1360_v0 }
  0x41   :  { %1179 = vmatpush3.bf16.msra.mxu0 %v1265_v57 }
  0x42   :  { %1180 = vmatprep.subr.bf16.mxu0 %v1360_v0 }
  0x45   :  { %1181 = vmatpush3.bf16.msra.mxu0 %v1266_v58 }
  0x46   :  { %1182 = vmatprep.subr.bf16.mxu0 %v1360_v0 }
  0x49   :  { %1183 = vmatpush3.bf16.msra.mxu0 %v1267_v59 }
  0x4a   :  { %1184 = vmatprep.subr.bf16.mxu0 %v1360_v0 }
  0x4d   :  { %1185 = vmatpush3.bf16.msra.mxu0 %v1268_v60 }
  0xf0   :  { %v203_v18 = vpop.f32.mrf.mxu0 }
  0xf1   :  { %v219_v21 = vmul.f32 %v203_v18, %v203_v18 }
  0xf2   :  { %v1148_v19 = vpop.f32.mrf.mxu0 }
  0xf4   :  { %v206_v20 = vpop.f32.mrf.mxu0 }
  0xf5   :  { %v210_v22 = vadd.f32 %v206_v20, %v203_v18  ;;  %v220_v23 = vmul.f32 %v206_v20, %v206_v20 }
  0xf6   :  { %v1149_v24 = vpop.f32.mrf.mxu0 }
  0xf7   :  { %v211_v25 = vrot.slane %v210_v22, 4  ;;  %v221_v26 = vadd.f32 %v220_v23, %v219_v21 }
  0xf9   :  { %v212_v27 = vadd.f32 %v211_v25, %v210_v22  ;;  %v222_v28 = vrot.slane %v221_v26, 4 }
  0xfb   :  { %v213_v29 = vrot.slane %v212_v27, 2  ;;  %v223_v30 = vadd.f32 %v222_v28, %v221_v26 }
  0xfd   :  { %v214_v31 = vadd.f32 %v213_v29, %v212_v27  ;;  %v224_v32 = vrot.slane %v223_v30, 2 }
  0xff   :  { %v215_v33 = vrot.slane %v214_v31, 1  ;;  %v225_v34 = vadd.f32 %v224_v32, %v223_v30  ;;  %v455_v32 = vld [vmem:[%s1510_s2] sm:$0xff] }
 0x101   :  { %v216_v35 = vadd.f32 %v215_v33, %v214_v31  ;;  %v226_v36 = vrot.slane %v225_v34, 1  ;;  %v456_v33 = vld [vmem:[%s1510_s2 + $0x8] sm:$0xff] }
 0x103   :  { %v218_v37 = vmul.f32 0.0625, %v216_v35  ;;  %v227_v38 = vadd.f32 %v226_v36, %v225_v34  ;;  %v460_v34 = vsel %vm459_vm5, %v455_v32, 0.0  ;;  %v467_v35 = vsel %vm459_vm5, %v456_v33, 0.0 }
 0x104   :  { %v493_v36 = vmul.f32 %v455_v32, %v455_v32 }
 0x105   :  { %v228_v39 = vmul.f32 0.0625, %v227_v38  ;;  %v231_v40 = vmul.f32 %v218_v37, %v218_v37  ;;  %v230_v43 = vsub.f32 %v206_v20, %v218_v37  ;;  %v229_v44 = vsub.f32 %v203_v18, %v218_v37 }
 0x106   :  { %v494_v37 = vmul.f32 %v456_v33, %v456_v33  ;;  %v461_v38 = vrot.slane %v460_v34, 4 }
 0x107   :  { %v232_v41 = vsub.f32 %v228_v39, %v231_v40  ;;  %v468_v39 = vrot.slane %v467_v35, 4  ;;  %v497_v40 = vsel %vm459_vm5, %v493_v36, 0.0 }
 0x109   :  { %v233_v42 = vadd.f32 1e-05, %v232_v41  ;;  %v504_v41 = vsel %vm459_vm5, %v494_v37, 0.0 }
 0x10b   :  { %1285 = vrsqrt.f32 %v233_v42  ;;  %v462_v42 = vadd.f32 %v461_v38, %v460_v34 }
 0x118   :  { %v1286_v45 = vpop.eup %1285 }
 0x119   :  { %v236_v46 = vmul.f32 %v1286_v45, %v230_v43  ;;  %v235_v47 = vmul.f32 %v1286_v45, %v229_v44  ;;  %v469_v43 = vadd.f32 %v468_v39, %v467_v35  ;;  %v498_v44 = vrot.slane %v497_v40, 4 }
 0x11a   :  { %v505_v45 = vrot.slane %v504_v41, 4 }
 0x11b   :  { %vm237_vm1 = vcmp.ge.f32.partialorder %v235_v47, 0.0  ;;  %vm238_vm2 = vcmp.ge.f32.partialorder %v236_v46, 0.0  ;;  %v239_v48 = vmul.f32 2.236068, %v235_v47  ;;  %v240_v49 = vmul.f32 2.236068, %v236_v46 }
 0x11d   :  { %v241_v50 = vsel %vm237_vm1, %v235_v47, %v239_v48  ;;  %v242_v51 = vsel %vm238_vm2, %v236_v46, %v240_v49  ;;  %v463_v46 = vrot.slane %v462_v42, 2  ;;  %v470_v47 = vrot.slane %v469_v43, 2 }
 0x11e   :  { %v243_v52 = vpack.c.bf16 %v242_v51, %v241_v50  ;;  %v499_v48 = vadd.f32 %v498_v44, %v497_v40  ;;  %v506_v49 = vadd.f32 %v505_v45, %v504_v41 }
 0x11f   :  { %v464_v50 = vadd.f32 %v463_v46, %v462_v42  ;;  %v471_v51 = vadd.f32 %v470_v47, %v469_v43 }
 0x120   :  { %1167 = vmatmul.mubr.bf16.vlgmr.msra.gmra.mxu1 %v243_v52  ;;  %v500_v52 = vrot.slane %v499_v48, 2  ;;  %v507_v53 = vrot.slane %v506_v49, 2 }
 0x121   :  { %v465_v54 = vrot.slane %v464_v50, 1  ;;  %v472_v55 = vrot.slane %v471_v51, 1 }
 0x122   :  { %v501_v56 = vadd.f32 %v500_v52, %v499_v48  ;;  %v508_v57 = vadd.f32 %v507_v53, %v506_v49 }
 0x123   :  { %v466_v58 = vadd.f32 %v465_v54, %v464_v50  ;;  %v473_v59 = vadd.f32 %v472_v55, %v471_v51 }
 0x124   :  { %v502_v60 = vrot.slane %v501_v56, 1 }
 0x1e0   :  { %v326_v61 = vpop.f32.mrf.mxu1 }
 0x1e1   :  { %v341_v1 = vmul.f32 %v326_v61, %v326_v61 }
 0x1e2   :  { %v1168_v62 = vpop.f32.mrf.mxu1 }
 0x1e3   :  { %v489_v62 = vmul.f32 0.125, %v466_v58 }
 0x1e4   :  { %v329_v63 = vpop.f32.mrf.mxu1 }
 0x1e5   :  { %v333_v2 = vadd.f32 %v329_v63, %v326_v61  ;;  %v342_v3 = vmul.f32 %v329_v63, %v329_v63 }
 0x1e6   :  { %v1169_v4 = vpop.f32.mrf.mxu1 }
 0x1e7   :  { %v334_v5 = vrot.slane %v333_v2, 4  ;;  %v343_v6 = vadd.f32 %v342_v3, %v341_v1  ;;  %v503_v1 = vadd.f32 %v502_v60, %v501_v56 }
 0x1e9   :  { %v335_v7 = vadd.f32 %v334_v5, %v333_v2  ;;  %v344_v8 = vrot.slane %v343_v6, 4  ;;  %v525_v3 = vmul.f32 0.125, %v503_v1  ;;  %v533_v5 = vmul.f32 %v489_v62, %v489_v62 }
 0x1eb   :  { %v336_v9 = vrot.slane %v335_v7, 2  ;;  %v345_v10 = vadd.f32 %v344_v8, %v343_v6 }
 0x1ed   :  { %v337_v11 = vadd.f32 %v336_v9, %v335_v7  ;;  %v346_v12 = vrot.slane %v345_v10, 2  ;;  %v537_v7 = vsub.f32 %v525_v3, %v533_v5 }
 0x1ef   :  { %v338_v13 = vrot.slane %v337_v11, 1  ;;  %v347_v14 = vadd.f32 %v346_v12, %v345_v10  ;;  %v541_v9 = vadd.f32 1e-05, %v537_v7 }
 0x1f1   :  { %v339_v0 = vadd.f32 %v338_v13, %v337_v11  ;;  %v348_v15 = vrot.slane %v347_v14, 1  ;;  %v529_v11 = vsub.f32 %v455_v32, %v489_v62 }
 0x1f3   :  { %v340_v16 = vmul.f32 0.0625, %v339_v0  ;;  %v349_v17 = vadd.f32 %v348_v15, %v347_v14 }
 0x1f5   :  { %v350_v18 = vmul.f32 0.0625, %v349_v17  ;;  %v353_v19 = vmul.f32 %v340_v16, %v340_v16  ;;  %v351_v22 = vsub.f32 %v326_v61, %v340_v16  ;;  %v352_v23 = vsub.f32 %v329_v63, %v340_v16  ;;  %v457_v17 = vld [vmem:[%s1510_s2 + $0x10] sm:$0xff] }
 0x1f6   :  { %v509_v61 = vrot.slane %v508_v57, 1  ;;  %v490_v63 = vmul.f32 0.125, %v473_v59 }
 0x1f7   :  { %v354_v20 = vsub.f32 %v350_v18, %v353_v19  ;;  %v458_v18 = vld [vmem:[%s1510_s2 + $0x18] sm:$0xff]  ;;  %v474_v19 = vsel %vm459_vm5, %v457_v17, 0.0 }
 0x1f8   :  { %v510_v2 = vadd.f32 %v509_v61, %v508_v57  ;;  %v534_v6 = vmul.f32 %v490_v63, %v490_v63  ;;  %v530_v12 = vsub.f32 %v456_v33, %v490_v63 }
 0x1f9   :  { %v355_v21 = vadd.f32 1e-05, %v354_v20  ;;  %v495_v20 = vmul.f32 %v457_v17, %v457_v17 }
 0x1fa   :  { %v526_v4 = vmul.f32 0.125, %v510_v2 }
 0x1fb   :  { %1287 = vrsqrt.f32 %v355_v21  ;;  %v481_v21 = vsel %vm459_vm5, %v458_v18, 0.0 }
 0x1fc   :  { %v538_v8 = vsub.f32 %v526_v4, %v534_v6  ;;  %1289 = vrsqrt.f32 %v541_v9  ;;  %v1270_v9 = vld [vmem:[#allocation2 + $0xf8] sm:$0xff]  }
 0x1fe   :  { %v542_v10 = vadd.f32 1e-05, %v538_v8  ;;  %v1269_v8 = vld [vmem:[#allocation2 + $0x100] sm:$0xff]  }
 0x200   :  { %1291 = vrsqrt.f32 %v542_v10  ;;  %v1271_v10 = vld [vmem:[#allocation2 + $0xf0] sm:$0xff]  }
 0x208   :  { %v1288_v24 = vpop.eup %1287 }
 0x209   :  { %v358_v25 = vmul.f32 %v1288_v24, %v352_v23  ;;  %v357_v26 = vmul.f32 %v1288_v24, %v351_v22  ;;  %v1290_v13 = vpop.eup %1289  ;;  %v496_v22 = vmul.f32 %v458_v18, %v458_v18  ;;  %v475_v23 = vrot.slane %v474_v19, 4 }
 0x20a   :  { %v549_v0 = vmul.f32 %v1290_v13, %v529_v11  ;;  %v482_v24 = vrot.slane %v481_v21, 4  ;;  %v1272_v11 = vld [vmem:[#allocation2 + $0xe8] sm:$0xff]   ;;  %v1274_v13 = vld [vmem:[#allocation2 + $0xd8] sm:$0xff]  }
 0x20b   :  { %vm360_vm3 = vcmp.ge.f32.partialorder %v358_v25, 0.0  ;;  %v362_v27 = vmul.f32 2.236068, %v358_v25  ;;  %vm359_vm4 = vcmp.ge.f32.partialorder %v357_v26, 0.0  ;;  %v361_v28 = vmul.f32 2.236068, %v357_v26 }
 0x20d   :  { %v363_v29 = vsel %vm359_vm4, %v357_v26, %v361_v28  ;;  %v364_v30 = vsel %vm360_vm3, %v358_v25, %v362_v27  ;;  %v1292_v14 = vpop.eup %1291  ;;  %v511_v25 = vsel %vm459_vm5, %v495_v20, 0.0  ;;  %v518_v26 = vsel %vm459_vm5, %v496_v22, 0.0 }
 0x20e   :  { %v365_v31 = vpack.c.bf16 %v364_v30, %v363_v29  ;;  %v550_v15 = vmul.f32 %v1292_v14, %v530_v12  ;;  %v476_v27 = vadd.f32 %v475_v23, %v474_v19  ;;  %v512_v28 = vrot.slane %v511_v25, 4  ;;  %v1273_v12 = vld [vmem:[#allocation2 + $0xe0] sm:$0xff]   ;;  %v1275_v14 = vld [vmem:[#allocation2 + $0xd0] sm:$0xff]  }
 0x20f   :  { %v483_v29 = vadd.f32 %v482_v24, %v481_v21  ;;  %v519_v30 = vrot.slane %v518_v26, 4 }
 0x210   :  { %1187 = vmatmul.mubr.bf16.vlgmr.msra.gmra.mxu0 %v365_v31  ;;  %v553_v16 = vpack.c.bf16 %v550_v15, %v549_v0  ;;  %v477_v31 = vrot.slane %v476_v27, 2  ;;  %v513_v32 = vadd.f32 %v512_v28, %v511_v25  ;;  %v1276_v0 = vld [vmem:[#allocation2 + $0xc8] sm:$0xff]   ;;  %v1059_v15 = vld [vmem:[%s1509_s1] ss:$0 sm:$0xff] }
 0x211   :  { %v484_v33 = vrot.slane %v483_v29, 2  ;;  %v520_v34 = vadd.f32 %v519_v30, %v518_v26 }
 0x212   :  { %1192 = vmatprep.mubr.msk.bf16.mxu1 %vm459_vm5, %v553_v16  ;;  %v478_v35 = vadd.f32 %v477_v31, %v476_v27  ;;  %v514_v36 = vrot.slane %v513_v32, 2 }
 0x213   :  { %v485_v37 = vadd.f32 %v484_v33, %v483_v29  ;;  %v521_v38 = vrot.slane %v520_v34, 2 }
 0x214   :  { %v479_v39 = vrot.slane %v478_v35, 1  ;;  %v515_v40 = vadd.f32 %v514_v36, %v513_v32 }
 0x215   :  { %v486_v41 = vrot.slane %v485_v37, 1  ;;  %v522_v42 = vadd.f32 %v521_v38, %v520_v34 }
 0x216   :  { %v480_v43 = vadd.f32 %v479_v39, %v478_v35  ;;  %v516_v44 = vrot.slane %v515_v40, 1 }
 0x217   :  { %v487_v45 = vadd.f32 %v486_v41, %v485_v37  ;;  %v523_v46 = vrot.slane %v522_v42, 1 }
 0x218   :  { %v491_v47 = vmul.f32 0.125, %v480_v43  ;;  %v517_v48 = vadd.f32 %v516_v44, %v515_v40 }
 0x219   :  { %v492_v49 = vmul.f32 0.125, %v487_v45  ;;  %v524_v50 = vadd.f32 %v523_v46, %v522_v42 }
 0x21a   :  { %v527_v51 = vmul.f32 0.125, %v517_v48  ;;  %v535_v52 = vmul.f32 %v491_v47, %v491_v47  ;;  %v531_v60 = vsub.f32 %v457_v17, %v491_v47 }
 0x21b   :  { %v528_v53 = vmul.f32 0.125, %v524_v50  ;;  %v536_v54 = vmul.f32 %v492_v49, %v492_v49  ;;  %v532_v61 = vsub.f32 %v458_v18, %v492_v49 }
 0x21c   :  { %v539_v55 = vsub.f32 %v527_v51, %v535_v52 }
 0x21d   :  { %v540_v56 = vsub.f32 %v528_v53, %v536_v54 }
 0x21e   :  { %v543_v57 = vadd.f32 1e-05, %v539_v55 }
 0x21f   :  { %v544_v58 = vadd.f32 1e-05, %v540_v56 }
 0x220   :  { %1293 = vrsqrt.f32 %v543_v57 }
 0x221   :  { %1295 = vrsqrt.f32 %v544_v58 }
 0x22d   :  { %v1294_v59 = vpop.eup %1293 }
 0x22e   :  { %v1296_v62 = vpop.eup %1295  ;;  %v551_v2 = vmul.f32 %v1294_v59, %v531_v60 }
 0x22f   :  { %v552_v3 = vmul.f32 %v1296_v62, %v532_v61 }
 0x231   :  { %v554_v7 = vpack.c.bf16 %v552_v3, %v551_v2 }
 0x2d0   :  { %v448_v63 = vpop.f32.mrf.mxu0 }
 0x2d2   :  { %v1188_v1 = vpop.f32.mrf.mxu0 }
 0x2d4   :  { %v451_v4 = vpop.f32.mrf.mxu0 }
 0x2d5   :  { %v555_v5 = vpack.c.bf16 %v451_v4, %v448_v63 }
 0x2d6   :  { %v1189_v6 = vpop.f32.mrf.mxu0 }
 0x2d7   :  { %1190 = vmatprep.subr.bf16.mxu1 %v555_v5 }
 0x2d8   :  { %1191 = vmatpush3.bf16.msra.mxu1 %v555_v5 }
 0x2d9   :  { %1196 = vmatprep.subr.bf16.mxu1 %v1269_v8 }
 0x2db   :  { %1193 = vmatmul.mubr.msk.bf16.vlgmr.msra.gmra.mxu1 %vm459_vm5, %v554_v7 }
 0x2dc   :  { %1197 = vmatpush3.bf16.msra.mxu1 %v1269_v8 }
 0x2dd   :  { %1198 = vmatprep.subr.bf16.mxu1 %v1270_v9 }
 0x2e0   :  { %1199 = vmatpush3.bf16.msra.mxu1 %v1270_v9 }
 0x2e1   :  { %1200 = vmatprep.subr.bf16.mxu1 %v1271_v10 }
 0x2e4   :  { %1201 = vmatpush3.bf16.msra.mxu1 %v1271_v10 }
 0x2e5   :  { %1202 = vmatprep.subr.bf16.mxu1 %v1272_v11 }
 0x2e8   :  { %1203 = vmatpush3.bf16.msra.mxu1 %v1272_v11 }
 0x2e9   :  { %1204 = vmatprep.subr.bf16.mxu1 %v1273_v12 }
 0x2ec   :  { %1205 = vmatpush3.bf16.msra.mxu1 %v1273_v12 }
 0x2ed   :  { %1206 = vmatprep.subr.bf16.mxu1 %v1274_v13 }
 0x2f0   :  { %1207 = vmatpush3.bf16.msra.mxu1 %v1274_v13 }
 0x2f1   :  { %1208 = vmatprep.subr.bf16.mxu1 %v1275_v14 }
 0x2f4   :  { %1209 = vmatpush3.bf16.msra.mxu1 %v1275_v14 }
 0x2f5   :  { %1210 = vmatprep.subr.bf16.mxu1 %v1276_v0 }
 0x2f8   :  { %1211 = vmatpush3.bf16.msra.mxu1 %v1276_v0 }
 0x39b   :  { %v1194_v16 = vpop.f32.mrf.mxu1 }
 0x39c   :  { %v1443_v17 = vadd.f32 %v1194_v16, %v1059_v15 }
 0x39d   :  { %v600_v18 = vpop.f32.mrf.mxu1 }
 0x39e   :  { %v627_v19 = vrot.slane %v1443_v17, 4  ;;  %v645_v20 = vmul.f32 %v1443_v17, %v1443_v17  ;;  %v1448_v21 = vadd.f32 %v1059_v15, %v600_v18 }
 0x39f   :  { %v1195_v22 = vpop.f32.mrf.mxu1 }
 0x3a0   :  { %v628_v23 = vadd.f32 %v627_v19, %v1443_v17  ;;  %v659_v24 = vrot.slane %v645_v20, 4  ;;  %v615_v25 = vrot.slane %v1448_v21, 4  ;;  %v643_v26 = vmul.f32 %v1448_v21, %v1448_v21 }
 0x3a1   :  { %v1454_v27 = vadd.f32 %v1195_v22, %v1059_v15  ;;  %v603_v28 = vpop.f32.mrf.mxu1 }
 0x3a2   :  { %v629_v29 = vrot.slane %v628_v23, 2  ;;  %v660_v30 = vadd.f32 %v659_v24, %v645_v20  ;;  %v616_v31 = vadd.f32 %v615_v25, %v1448_v21  ;;  %v647_v32 = vrot.slane %v643_v26, 4 }
 0x3a3   :  { %v633_v33 = vrot.slane %v1454_v27, 4  ;;  %v646_v34 = vmul.f32 %v1454_v27, %v1454_v27  ;;  %v1460_v35 = vadd.f32 %v1059_v15, %v603_v28 }
 0x3a4   :  { %v630_v36 = vadd.f32 %v629_v29, %v628_v23  ;;  %v661_v37 = vrot.slane %v660_v30, 2  ;;  %v617_v38 = vrot.slane %v616_v31, 2  ;;  %v648_v39 = vadd.f32 %v647_v32, %v643_v26 }
 0x3a5   :  { %v634_v40 = vadd.f32 %v633_v33, %v1454_v27  ;;  %v665_v41 = vrot.slane %v646_v34, 4  ;;  %v621_v42 = vrot.slane %v1460_v35, 4  ;;  %v644_v43 = vmul.f32 %v1460_v35, %v1460_v35 }
 0x3a6   :  { %v631_v44 = vrot.slane %v630_v36, 1  ;;  %v662_v45 = vadd.f32 %v661_v37, %v660_v30  ;;  %v618_v46 = vadd.f32 %v617_v38, %v616_v31  ;;  %v649_v47 = vrot.slane %v648_v39, 2 }
 0x3a7   :  { %v635_v48 = vrot.slane %v634_v40, 2  ;;  %v666_v49 = vadd.f32 %v665_v41, %v646_v34  ;;  %v622_v50 = vadd.f32 %v621_v42, %v1460_v35  ;;  %v653_v51 = vrot.slane %v644_v43, 4 }
 0x3a8   :  { %v632_v52 = vadd.f32 %v631_v44, %v630_v36  ;;  %v663_v53 = vrot.slane %v662_v45, 1  ;;  %v619_v54 = vrot.slane %v618_v46, 1  ;;  %v650_v55 = vadd.f32 %v649_v47, %v648_v39 }
 0x3a9   :  { %v636_v56 = vadd.f32 %v635_v48, %v634_v40  ;;  %v667_v57 = vrot.slane %v666_v49, 2  ;;  %v623_v58 = vrot.slane %v622_v50, 2  ;;  %v654_v59 = vadd.f32 %v653_v51, %v644_v43 }
 0x3aa   :  { %v641_v60 = vmul.f32 0.125, %v632_v52  ;;  %v664_v61 = vadd.f32 %v663_v53, %v662_v45  ;;  %v620_v62 = vadd.f32 %v619_v54, %v618_v46  ;;  %v651_v63 = vrot.slane %v650_v55, 1 }
 0x3ab   :  { %v637_v1 = vrot.slane %v636_v56, 1  ;;  %v668_v2 = vadd.f32 %v667_v57, %v666_v49  ;;  %v624_v3 = vadd.f32 %v623_v58, %v622_v50  ;;  %v655_v4 = vrot.slane %v654_v59, 2  ;;  %v1280_v57 = vld [vmem:[#allocation2 + $0x128] sm:$0xff]   ;;  %v1281_v58 = vld [vmem:[#allocation2 + $0x120] sm:$0xff]  }
 0x3ac   :  { %v673_v5 = vmul.f32 0.125, %v664_v61  ;;  %v681_v6 = vmul.f32 %v641_v60, %v641_v60  ;;  %v639_v7 = vmul.f32 0.125, %v620_v62  ;;  %v652_v8 = vadd.f32 %v651_v63, %v650_v55  ;;  %v1277_v55 = vld [vmem:[#allocation2 + $0x140] sm:$0xff]   ;;  %v1284_v61 = vld [vmem:[#allocation2 + $0x108] sm:$0xff]  }
 0x3ad   :  { %v638_v9 = vadd.f32 %v637_v1, %v636_v56  ;;  %v669_v10 = vrot.slane %v668_v2, 1  ;;  %v625_v11 = vrot.slane %v624_v3, 1  ;;  %v656_v14 = vadd.f32 %v655_v4, %v654_v59  ;;  %1216 = vmatprep.subr.bf16.mxu0 %v1277_v55  ;;  %v1279_v56 = vld [vmem:[#allocation2 + $0x130] sm:$0xff]   ;;  %v1282_v59 = vld [vmem:[#allocation2 + $0x118] sm:$0xff]   ;;  %v1062_v62 = vld [vmem:[%s1509_s1 + $0x1] ss:$0 sm:$0xff] }
 0x3ae   :  { %v685_v12 = vsub.f32 %v673_v5, %v681_v6  ;;  %v679_v13 = vmul.f32 %v639_v7, %v639_v7  ;;  %v671_v0 = vmul.f32 0.125, %v652_v8  ;;  %v675_v38 = vsub.f32 %v1448_v21, %v639_v7  ;;  %1217 = vmatpush3.bf16.msra.mxu0 %v1277_v55 }
 0x3af   :  { %v642_v15 = vmul.f32 0.125, %v638_v9  ;;  %v670_v16 = vadd.f32 %v669_v10, %v668_v2  ;;  %v626_v18 = vadd.f32 %v625_v11, %v624_v3  ;;  %v657_v20 = vrot.slane %v656_v14, 1 }
 0x3b0   :  { %v689_v19 = vadd.f32 1e-05, %v685_v12  ;;  %v683_v22 = vsub.f32 %v671_v0, %v679_v13  ;;  %v677_v39 = vsub.f32 %v1443_v17, %v641_v60  ;;  %v1283_v60 = vld [vmem:[#allocation2 + $0x110] sm:$0xff]  }
 0x3b1   :  { %v674_v23 = vmul.f32 0.125, %v670_v16  ;;  %v682_v24 = vmul.f32 %v642_v15, %v642_v15  ;;  %v640_v25 = vmul.f32 0.125, %v626_v18  ;;  %v658_v26 = vadd.f32 %v657_v20, %v656_v14 }
 0x3b2   :  { %v687_v28 = vadd.f32 1e-05, %v683_v22  ;;  %1297 = vrsqrt.f32 %v689_v19  ;;  %v678_v40 = vsub.f32 %v1454_v27, %v642_v15 }
 0x3b3   :  { %v686_v29 = vsub.f32 %v674_v23, %v682_v24  ;;  %v672_v30 = vmul.f32 0.125, %v658_v26  ;;  %v680_v31 = vmul.f32 %v640_v25, %v640_v25  ;;  %v676_v45 = vsub.f32 %v1460_v35, %v640_v25  ;;  %v1278_v35 = vld [vmem:[#allocation2 + $0x138] sm:$0xff]  }
 0x3b4   :  { %1299 = vrsqrt.f32 %v687_v28  ;;  %1218 = vmatprep.subr.bf16.mxu0 %v1278_v35 }
 0x3b5   :  { %v690_v32 = vadd.f32 1e-05, %v686_v29  ;;  %v684_v33 = vsub.f32 %v672_v30, %v680_v31  ;;  %1219 = vmatpush3.bf16.msra.mxu0 %v1278_v35 }
 0x3b6   :  { %1220 = vmatprep.subr.bf16.mxu0 %v1279_v56 }
 0x3b7   :  { %1301 = vrsqrt.f32 %v690_v32  ;;  %v688_v34 = vadd.f32 1e-05, %v684_v33 }
 0x3b9   :  { %1303 = vrsqrt.f32 %v688_v34  ;;  %1221 = vmatpush3.bf16.msra.mxu0 %v1279_v56 }
 0x3ba   :  { %1222 = vmatprep.subr.bf16.mxu0 %v1280_v57 }
 0x3bd   :  { %1223 = vmatpush3.bf16.msra.mxu0 %v1280_v57 }
 0x3be   :  { %1224 = vmatprep.subr.bf16.mxu0 %v1281_v58 }
 0x3bf   :  { %v1298_v36 = vpop.eup %1297 }
 0x3c0   :  { %v697_v43 = vmul.f32 %v1298_v36, %v677_v39 }
 0x3c1   :  { %v1300_v37 = vpop.eup %1299  ;;  %1225 = vmatpush3.bf16.msra.mxu0 %v1281_v58 }
 0x3c2   :  { %v695_v42 = vmul.f32 %v1300_v37, %v675_v38  ;;  %v705_v50 = vmul.f32 2.236068, %v697_v43  ;;  %vm701_vm9 = vcmp.ge.f32.partialorder %v697_v43, 0.0  ;;  %1226 = vmatprep.subr.bf16.mxu0 %v1282_v59 }
 0x3c4   :  { %v1302_v41 = vpop.eup %1301  ;;  %v703_v49 = vmul.f32 2.236068, %v695_v42  ;;  %vm699_vm7 = vcmp.ge.f32.partialorder %v695_v42, 0.0  ;;  %v709_v53 = vsel %vm701_vm9, %v697_v43, %v705_v50 }
 0x3c5   :  { %v698_v44 = vmul.f32 %v1302_v41, %v678_v40  ;;  %1227 = vmatpush3.bf16.msra.mxu0 %v1282_v59 }
 0x3c6   :  { %v1304_v46 = vpop.eup %1303  ;;  %v707_v17 = vsel %vm699_vm7, %v695_v42, %v703_v49  ;;  %1228 = vmatprep.subr.bf16.mxu0 %v1283_v60 }
 0x3c7   :  { %v706_v47 = vmul.f32 2.236068, %v698_v44  ;;  %v696_v48 = vmul.f32 %v1304_v46, %v676_v45  ;;  %vm702_vm6 = vcmp.ge.f32.partialorder %v698_v44, 0.0 }
 0x3c9   :  { %vm700_vm8 = vcmp.ge.f32.partialorder %v696_v48, 0.0  ;;  %v704_v51 = vmul.f32 2.236068, %v696_v48  ;;  %v710_v21 = vsel %vm702_vm6, %v698_v44, %v706_v47  ;;  %1229 = vmatpush3.bf16.msra.mxu0 %v1283_v60 }
 0x3ca   :  { %v712_v54 = vpack.c.bf16 %v710_v21, %v709_v53  ;;  %1230 = vmatprep.subr.bf16.mxu0 %v1284_v61 }
 0x3cb   :  { %v708_v52 = vsel %vm700_vm8, %v696_v48, %v704_v51 }
 0x3cc   :  { %v711_v27 = vpack.c.bf16 %v708_v52, %v707_v17 }
 0x3cd   :  { %1231 = vmatpush3.bf16.msra.mxu0 %v1284_v61 }
 0x3ce   :  { %1212 = vmatprep.mubr.bf16.mxu1 %v711_v27 }
 0x3cf   :  { %1213 = vmatmul.mubr.bf16.vlgmr.msra.gmra.mxu1 %v712_v54 }
 0x48f   :  { %v1214_v63 = vpop.f32.mrf.mxu1 }
 0x490   :  { %v1474_v1 = vadd.f32 %v1214_v63, %v1062_v62 }
 0x491   :  { %v799_v2 = vpop.f32.mrf.mxu1 }
 0x492   :  { %v826_v3 = vrot.slane %v1474_v1, 4  ;;  %v844_v4 = vmul.f32 %v1474_v1, %v1474_v1  ;;  %v1479_v5 = vadd.f32 %v1062_v62, %v799_v2 }
 0x493   :  { %v1215_v6 = vpop.f32.mrf.mxu1 }
 0x494   :  { %v827_v7 = vadd.f32 %v826_v3, %v1474_v1  ;;  %v858_v8 = vrot.slane %v844_v4, 4  ;;  %v814_v9 = vrot.slane %v1479_v5, 4  ;;  %v842_v10 = vmul.f32 %v1479_v5, %v1479_v5 }
 0x495   :  { %v1485_v11 = vadd.f32 %v1215_v6, %v1062_v62  ;;  %v802_v12 = vpop.f32.mrf.mxu1 }
 0x496   :  { %v828_v13 = vrot.slane %v827_v7, 2  ;;  %v859_v14 = vadd.f32 %v858_v8, %v844_v4  ;;  %v815_v0 = vadd.f32 %v814_v9, %v1479_v5  ;;  %v846_v15 = vrot.slane %v842_v10, 4 }
 0x497   :  { %v832_v16 = vrot.slane %v1485_v11, 4  ;;  %v845_v18 = vmul.f32 %v1485_v11, %v1485_v11  ;;  %v1491_v19 = vadd.f32 %v1062_v62, %v802_v12 }
 0x498   :  { %v829_v20 = vadd.f32 %v828_v13, %v827_v7  ;;  %v860_v22 = vrot.slane %v859_v14, 2  ;;  %v816_v23 = vrot.slane %v815_v0, 2  ;;  %v847_v24 = vadd.f32 %v846_v15, %v842_v10 }
 0x499   :  { %v833_v25 = vadd.f32 %v832_v16, %v1485_v11  ;;  %v864_v26 = vrot.slane %v845_v18, 4  ;;  %v820_v28 = vrot.slane %v1491_v19, 4  ;;  %v843_v29 = vmul.f32 %v1491_v19, %v1491_v19 }
 0x49a   :  { %v830_v30 = vrot.slane %v829_v20, 1  ;;  %v861_v31 = vadd.f32 %v860_v22, %v859_v14  ;;  %v817_v32 = vadd.f32 %v816_v23, %v815_v0  ;;  %v848_v33 = vrot.slane %v847_v24, 2 }
 0x49b   :  { %v834_v34 = vrot.slane %v833_v25, 2  ;;  %v865_v36 = vadd.f32 %v864_v26, %v845_v18  ;;  %v821_v37 = vadd.f32 %v820_v28, %v1491_v19  ;;  %v852_v38 = vrot.slane %v843_v29, 4 }
 0x49c   :  { %v831_v39 = vadd.f32 %v830_v30, %v829_v20  ;;  %v862_v40 = vrot.slane %v861_v31, 1  ;;  %v818_v41 = vrot.slane %v817_v32, 1  ;;  %v849_v42 = vadd.f32 %v848_v33, %v847_v24 }
 0x49d   :  { %v835_v43 = vadd.f32 %v834_v34, %v833_v25  ;;  %v866_v44 = vrot.slane %v865_v36, 2  ;;  %v822_v45 = vrot.slane %v821_v37, 2  ;;  %v853_v46 = vadd.f32 %v852_v38, %v843_v29 }
 0x49e   :  { %v840_v47 = vmul.f32 0.125, %v831_v39  ;;  %v863_v48 = vadd.f32 %v862_v40, %v861_v31  ;;  %v819_v49 = vadd.f32 %v818_v41, %v817_v32  ;;  %v850_v50 = vrot.slane %v849_v42, 1 }
 0x49f   :  { %v836_v51 = vrot.slane %v835_v43, 1  ;;  %v867_v21 = vadd.f32 %v866_v44, %v865_v36  ;;  %v823_v17 = vadd.f32 %v822_v45, %v821_v37  ;;  %v854_v52 = vrot.slane %v853_v46, 2 }
 0x4a0   :  { %v872_v27 = vmul.f32 0.125, %v863_v48  ;;  %v880_v53 = vmul.f32 %v840_v47, %v840_v47  ;;  %v838_v54 = vmul.f32 0.125, %v819_v49  ;;  %v851_v55 = vadd.f32 %v850_v50, %v849_v42 }
 0x4a1   :  { %v837_v35 = vadd.f32 %v836_v51, %v835_v43  ;;  %v868_v56 = vrot.slane %v867_v21, 1  ;;  %v824_v57 = vrot.slane %v823_v17, 1  ;;  %v855_v60 = vadd.f32 %v854_v52, %v853_v46 }
 0x4a2   :  { %v884_v58 = vsub.f32 %v872_v27, %v880_v53  ;;  %v878_v59 = vmul.f32 %v838_v54, %v838_v54  ;;  %v870_v61 = vmul.f32 0.125, %v851_v55  ;;  %v874_v23 = vsub.f32 %v1479_v5, %v838_v54 }
 0x4a3   :  { %v841_v62 = vmul.f32 0.125, %v837_v35  ;;  %v869_v63 = vadd.f32 %v868_v56, %v867_v21  ;;  %v825_v2 = vadd.f32 %v824_v57, %v823_v17  ;;  %v856_v4 = vrot.slane %v855_v60, 1 }
 0x4a4   :  { %v888_v3 = vadd.f32 1e-05, %v884_v58  ;;  %v882_v6 = vsub.f32 %v870_v61, %v878_v59  ;;  %v876_v24 = vsub.f32 %v1474_v1, %v840_v47 }
 0x4a5   :  { %v873_v7 = vmul.f32 0.125, %v869_v63  ;;  %v881_v8 = vmul.f32 %v841_v62, %v841_v62  ;;  %v839_v9 = vmul.f32 0.125, %v825_v2  ;;  %v857_v10 = vadd.f32 %v856_v4, %v855_v60 }
 0x4a6   :  { %v886_v12 = vadd.f32 1e-05, %v882_v6  ;;  %1305 = vrsqrt.f32 %v888_v3  ;;  %v877_v25 = vsub.f32 %v1485_v11, %v841_v62 }
 0x4a7   :  { %v885_v13 = vsub.f32 %v873_v7, %v881_v8  ;;  %v871_v14 = vmul.f32 0.125, %v857_v10  ;;  %v879_v0 = vmul.f32 %v839_v9, %v839_v9  ;;  %v875_v31 = vsub.f32 %v1491_v19, %v839_v9  ;;  %v1071_v19 = vld [vmem:[%s1509_s1 + $0x2] ss:$0 sm:$0xff] }
 0x4a8   :  { %1307 = vrsqrt.f32 %v886_v12 }
 0x4a9   :  { %v889_v15 = vadd.f32 1e-05, %v885_v13  ;;  %v883_v16 = vsub.f32 %v871_v14, %v879_v0 }
 0x4ab   :  { %1309 = vrsqrt.f32 %v889_v15  ;;  %v887_v18 = vadd.f32 1e-05, %v883_v16 }
 0x4ad   :  { %1311 = vrsqrt.f32 %v887_v18 }
 0x4b3   :  { %v1306_v20 = vpop.eup %1305 }
 0x4b4   :  { %v896_v29 = vmul.f32 %v1306_v20, %v876_v24 }
 0x4b5   :  { %v1308_v22 = vpop.eup %1307 }
 0x4b6   :  { %v894_v28 = vmul.f32 %v1308_v22, %v874_v23  ;;  %v904_v37 = vmul.f32 2.236068, %v896_v29  ;;  %vm900_vm13 = vcmp.ge.f32.partialorder %v896_v29, 0.0 }
 0x4b8   :  { %v1310_v26 = vpop.eup %1309  ;;  %v902_v36 = vmul.f32 2.236068, %v894_v28  ;;  %vm898_vm11 = vcmp.ge.f32.partialorder %v894_v28, 0.0  ;;  %v908_v40 = vsel %vm900_vm13, %v896_v29, %v904_v37 }
 0x4b9   :  { %v897_v30 = vmul.f32 %v1310_v26, %v877_v25 }
 0x4ba   :  { %v1312_v32 = vpop.eup %1311  ;;  %v906_v1 = vsel %vm898_vm11, %v894_v28, %v902_v36 }
 0x4bb   :  { %v905_v33 = vmul.f32 2.236068, %v897_v30  ;;  %v895_v34 = vmul.f32 %v1312_v32, %v875_v31  ;;  %vm901_vm10 = vcmp.ge.f32.partialorder %v897_v30, 0.0 }
 0x4bd   :  { %vm899_vm12 = vcmp.ge.f32.partialorder %v895_v34, 0.0  ;;  %v903_v38 = vmul.f32 2.236068, %v895_v34  ;;  %v909_v5 = vsel %vm901_vm10, %v897_v30, %v905_v33 }
 0x4be   :  { %v911_v41 = vpack.c.bf16 %v909_v5, %v908_v40 }
 0x4bf   :  { %v907_v39 = vsel %vm899_vm12, %v895_v34, %v903_v38 }
 0x4c0   :  { %v910_v11 = vpack.c.bf16 %v907_v39, %v906_v1 }
 0x4c2   :  { %1232 = vmatprep.mubr.bf16.mxu0 %v910_v11 }
 0x4c3   :  { %1233 = vmatmul.mubr.bf16.vlgmr.msra.gmra.mxu0 %v911_v41 }
 0x583   :  { %v1234_v42 = vpop.f32.mrf.mxu0 }
 0x584   :  { %v1007_v43 = vadd.f32 %v1234_v42, %v1071_v19 }
 0x585   :  { %v998_v44 = vpop.f32.mrf.mxu0 }
 0x586   :  { %1015 = vst [vmem:[#allocation5 + $0x10] sm:$0xff] %v1007_v43  ;;  %v999_v45 = vadd.f32 %v1071_v19, %v998_v44 }
 0x587   :  { %v1235_v46 = vpop.f32.mrf.mxu0 }
 0x588   :  { %1013 = vst [vmem:[#allocation5] sm:$0xff] %v999_v45  ;;  %v1010_v47 = vadd.f32 %v1235_v46, %v1071_v19 }
 0x589   :  { %v1001_v48 = vpop.f32.mrf.mxu0 }
 0x58a   :  { %1016 = vst [vmem:[#allocation5 + $0x18] sm:$0xff] %v1010_v47  ;;  %v1002_v49 = vadd.f32 %v1071_v19, %v1001_v48 }
 0x58c   :  { %1014 = vst [vmem:[#allocation5 + $0x8] sm:$0xff] %v1002_v49 }
 0x58d   :  { %1344 = shalt.err (!%p1341_p9)
}
 0x58e   :  { %s1363_s1 = smov 128   ;;  %s1364_s7 = smov 8  }
 0x58f   :  { %1028 = dma.vmem_to_hbm [thread:$0]  %s1023_s5, 512, %s1511_s3, [#allocation4], %s1363_s1, %s1363_s1, %s1364_s7  }
 0x590   :  { %1355 = dma.done.wait [#allocation4], 512  }
 0x591   :  { %1356 = vsyncadd [#allocation4], 4294966784 }
 0x592   :  { %1032 = vsyncpa [#allocation3], 1 }
 0x593   :  { %1033 = vsyncpa [#allocation4], 1 }

</bundles_post_ra>
